<compile_context>
chip_gen: v7x
topology: tpu7x:2x2x1
jax: 0.10.0
libtpu: 0.0.40
codegen_flags: <defaults>
</compile_context>

<pallas_src>
import functools

import jax
import jax.numpy as jnp
from jax.experimental import pallas as pl
from jax.experimental.pallas import tpu as pltpu


def _se_kernel(x_ref, w1t_ref, b1_ref, w2t_ref, b2_ref, o_ref, *, inv_hw):
    # x_ref: (TB, C, HWp) for the current batch tile.
    x = x_ref[...]
    xf = x.astype(jnp.float32)

    # Squeeze: global average pool over spatial (padded lanes are zero).
    pooled = jnp.sum(xf, axis=-1) * inv_hw                       # (TB, C)

    # fc1 (1x1 conv C -> S) + ReLU  (delta).  MXU shape (TB,C)@(C,S).
    h = jnp.dot(pooled, w1t_ref[...],
                preferred_element_type=jnp.float32) + b1_ref[...]   # (TB, S)
    h = jnp.maximum(h, 0.0)

    # fc2 (1x1 conv S -> C) + Sigmoid  (sigma).  MXU shape (TB,S)@(S,C).
    s = jnp.dot(h, w2t_ref[...],
                preferred_element_type=jnp.float32) + b2_ref[...]   # (TB, C)
    s = jax.nn.sigmoid(s)

    # Excitation: channel-wise scale, broadcast over spatial.
    o_ref[...] = (xf * s[:, :, None]).astype(o_ref.dtype)


def squeeze_excitation(x_nchw, w1, b1, w2, b2):
    """x_nchw: (N, C, H, W); w1: (S, C); b1: (S,); w2: (C, S); b2: (C,)."""
    N, C, H, W = x_nchw.shape
    S = w1.shape[0]
    HW = H * W

    # Lane-dense spatial axis: pad HW up to a multiple of 128 with zeros.
    HWp = ((HW + 127) // 128) * 128
    x_flat = x_nchw.reshape(N, C, HW)
    if HWp != HW:
        x_flat = jnp.pad(x_flat, ((0, 0), (0, 0), (0, HWp - HW)))

    # Batch-tile size: keep (in + out) double-buffered slabs under a budget
    # that fits all generations (v7x has only 64 MiB physical VMEM / TC).
    itemsize = jnp.dtype(x_nchw.dtype).itemsize
    slab_bytes = C * HWp * itemsize
    vmem_budget = 32 * 1024 * 1024          # x + out, 2-deep buffers = 4 slabs/elem
    tb = max(1, vmem_budget // (4 * slab_bytes))
    tb = int(min(tb, N, 64))

    # Pad batch to a multiple of TB (padded rows are zero; sliced off below).
    Np = ((N + tb - 1) // tb) * tb
    if Np != N:
        x_flat = jnp.pad(x_flat, ((0, Np - N), (0, 0), (0, 0)))

    # Weights transposed so the batch tile is the matmul M-dimension;
    # biases as (1, S) / (1, C) rows for broadcast over the batch tile.
    w1t = jnp.transpose(w1)            # (C, S)
    w2t = jnp.transpose(w2)            # (S, C)
    b1r = b1.reshape(1, S)
    b2r = b2.reshape(1, C)

    kernel = functools.partial(_se_kernel, inv_hw=1.0 / float(HW))

    out_flat = pl.pallas_call(
        kernel,
        out_shape=jax.ShapeDtypeStruct((Np, C, HWp), x_nchw.dtype),
        grid_spec=pltpu.PrefetchScalarGridSpec(
            num_scalar_prefetch=0,
            grid=(Np // tb,),
            in_specs=[
                pl.BlockSpec((tb, C, HWp), lambda n: (n, 0, 0)),
                pl.BlockSpec((C, S), lambda n: (0, 0)),
                pl.BlockSpec((1, S), lambda n: (0, 0)),
                pl.BlockSpec((S, C), lambda n: (0, 0)),
                pl.BlockSpec((1, C), lambda n: (0, 0)),
            ],
            out_specs=pl.BlockSpec((tb, C, HWp), lambda n: (n, 0, 0)),
        ),
        compiler_params=pltpu.CompilerParams(
            dimension_semantics=("parallel",),
            vmem_limit_bytes=48 * 1024 * 1024,
        ),
    )(x_flat, w1t, b1r, w2t, b2r)

    # Strip batch / spatial padding and restore NCHW.
    return out_flat[:N, :, :HW].reshape(N, C, H, W)


def _reference(x, w1, b1, w2, b2):
    # Pure-JAX reference mirroring the PyTorch module.
    pooled = jnp.mean(x, axis=(2, 3), keepdims=True)          # (N, C, 1, 1)
    h = jnp.einsum("sc,nchw->nshw", w1, pooled) + b1[None, :, None, None]
    h = jnp.maximum(h, 0.0)
    s = jnp.einsum("cs,nshw->nchw", w2, h) + b2[None, :, None, None]
    s = jax.nn.sigmoid(s)
    return s * x


if __name__ == "__main__":
    key = jax.random.PRNGKey(0)
    k_x, k_w1, k_b1, k_w2, k_b2 = jax.random.split(key, 5)

    N, C, H, W = 2, 4, 16, 16
    S = 2  # squeeze_channels

    x = jax.random.normal(k_x, (N, C, H, W), dtype=jnp.float32)
    w1 = jax.random.normal(k_w1, (S, C), dtype=jnp.float32) * 0.5
    b1 = jax.random.normal(k_b1, (S,), dtype=jnp.float32) * 0.1
    w2 = jax.random.normal(k_w2, (C, S), dtype=jnp.float32) * 0.5
    b2 = jax.random.normal(k_b2, (C,), dtype=jnp.float32) * 0.1

    out = squeeze_excitation(x, w1, b1, w2, b2)
    out = jax.block_until_ready(out)

    ref = _reference(x, w1, b1, w2, b2)
    assert out.shape == (N, C, H, W)
    assert jnp.allclose(out, ref, atol=1e-5, rtol=1e-5), "mismatch vs reference"

    # Also exercise the HW-padding path (7x7 spatial, like late MobileNetV3 stages).
    x2 = jax.random.normal(k_x, (3, C, 7, 7), dtype=jnp.float32)
    out2 = jax.block_until_ready(squeeze_excitation(x2, w1, b1, w2, b2))
    ref2 = _reference(x2, w1, b1, w2, b2)
    assert jnp.allclose(out2, ref2, atol=1e-5, rtol=1e-5), "mismatch (padded HW)"

    print("KERNEL_OK")
</pallas_src>

<mosaic_0001>
module attributes {stable_mosaic.version = 11 : i64} {
  func.func @_se_kernel(%arg0: i32, %arg1: memref<2x4x256xf32, #tpu.memory_space<vmem>>, %arg2: memref<4x2xf32, #tpu.memory_space<vmem>>, %arg3: memref<1x2xf32, #tpu.memory_space<vmem>>, %arg4: memref<2x4xf32, #tpu.memory_space<vmem>>, %arg5: memref<1x4xf32, #tpu.memory_space<vmem>>, %arg6: memref<2x4x256xf32, #tpu.memory_space<vmem>>) attributes {dimension_semantics = [#tpu.dimension_semantics<parallel>], iteration_bounds = array<i64: 1>, scalar_prefetch = 0 : i64, scratch_operands = 0 : i64, tpu.core_type = #tpu.core_type<tc>, window_params = [{transform_indices = @transform_0, window_bounds = array<i64: 2, 4, 256>}, {pipeline_mode = #tpu.pipeline_mode<synchronous>, transform_indices = @transform_1, window_bounds = array<i64: 4, 2>}, {pipeline_mode = #tpu.pipeline_mode<synchronous>, transform_indices = @transform_2, window_bounds = array<i64: 1, 2>}, {pipeline_mode = #tpu.pipeline_mode<synchronous>, transform_indices = @transform_3, window_bounds = array<i64: 2, 4>}, {pipeline_mode = #tpu.pipeline_mode<synchronous>, transform_indices = @transform_4, window_bounds = array<i64: 1, 4>}, {transform_indices = @transform_5, window_bounds = array<i64: 2, 4, 256>}]} {
    %c0 = arith.constant 0 : index
    %c0_0 = arith.constant 0 : index
    %c0_1 = arith.constant 0 : index
    %0 = vector.load %arg1[%c0, %c0_0, %c0_1] : memref<2x4x256xf32, #tpu.memory_space<vmem>>, vector<2x4x256xf32>
    %cst = arith.constant dense<0.000000e+00> : vector<2x4xf32>
    %1 = vector.multi_reduction <add>, %0, %cst [2] : vector<2x4x256xf32> to vector<2x4xf32>
    %cst_2 = arith.constant 3.906250e-03 : f32
    %2 = vector.broadcast %cst_2 : f32 to vector<2x4xf32>
    %3 = arith.mulf %1, %2 : vector<2x4xf32>
    %c0_3 = arith.constant 0 : index
    %c0_4 = arith.constant 0 : index
    %4 = vector.load %arg2[%c0_3, %c0_4] : memref<4x2xf32, #tpu.memory_space<vmem>>, vector<4x2xf32>
    %cst_5 = arith.constant dense<0.000000e+00> : vector<2x2xf32>
    %5 = tpu.matmul %3, %4, %cst_5 {dimension_numbers = #tpu.dot_dimension_numbers<[1], [0], [0], [1], [0, 0, 1, 1], [], []>} : vector<2x4xf32>, vector<4x2xf32>, vector<2x2xf32> -> vector<2x2xf32>
    %c0_6 = arith.constant 0 : index
    %c0_7 = arith.constant 0 : index
    %6 = vector.load %arg3[%c0_6, %c0_7] : memref<1x2xf32, #tpu.memory_space<vmem>>, vector<1x2xf32>
    %7 = vector.broadcast %6 : vector<1x2xf32> to vector<2x2xf32>
    %8 = arith.addf %5, %7 : vector<2x2xf32>
    %cst_8 = arith.constant 0.000000e+00 : f32
    %9 = vector.broadcast %cst_8 : f32 to vector<2x2xf32>
    %10 = arith.maximumf %8, %9 : vector<2x2xf32>
    %c0_9 = arith.constant 0 : index
    %c0_10 = arith.constant 0 : index
    %11 = vector.load %arg4[%c0_9, %c0_10] : memref<2x4xf32, #tpu.memory_space<vmem>>, vector<2x4xf32>
    %cst_11 = arith.constant dense<0.000000e+00> : vector<2x4xf32>
    %12 = tpu.matmul %10, %11, %cst_11 {dimension_numbers = #tpu.dot_dimension_numbers<[1], [0], [0], [1], [0, 0, 1, 1], [], []>} : vector<2x2xf32>, vector<2x4xf32>, vector<2x4xf32> -> vector<2x4xf32>
    %c0_12 = arith.constant 0 : index
    %c0_13 = arith.constant 0 : index
    %13 = vector.load %arg5[%c0_12, %c0_13] : memref<1x4xf32, #tpu.memory_space<vmem>>, vector<1x4xf32>
    %14 = vector.broadcast %13 : vector<1x4xf32> to vector<2x4xf32>
    %15 = arith.addf %12, %14 : vector<2x4xf32>
    %16 = arith.negf %15 : vector<2x4xf32>
    %17 = math.exp %16 : vector<2x4xf32>
    %cst_14 = arith.constant 1.000000e+00 : f32
    %18 = vector.broadcast %cst_14 : f32 to vector<2x4xf32>
    %19 = arith.addf %18, %17 : vector<2x4xf32>
    %20 = arith.divf %18, %19 : vector<2x4xf32>
    %21 = vector.shape_cast %20 : vector<2x4xf32> to vector<2x4x1xf32>
    %22 = vector.broadcast %21 : vector<2x4x1xf32> to vector<2x4x256xf32>
    %23 = arith.mulf %0, %22 : vector<2x4x256xf32>
    %c0_15 = arith.constant 0 : index
    %c0_16 = arith.constant 0 : index
    %c0_17 = arith.constant 0 : index
    %24 = vector.load %arg6[%c0_15, %c0_16, %c0_17] : memref<2x4x256xf32, #tpu.memory_space<vmem>>, vector<2x4x256xf32>
    tpu.vector_store %arg6[%c0_15, %c0_16, %c0_17], %23 {strides = array<i32>} : memref<2x4x256xf32, #tpu.memory_space<vmem>>, vector<2x4x256xf32>,
    return
  }
  func.func @transform_0(%arg0: i32) -> (i32, i32, i32) {
    %c0_i32 = arith.constant 0 : i32
    %c0_i32_0 = arith.constant 0 : i32
    %c0_i32_1 = arith.constant 0 : i32
    return %arg0, %c0_i32, %c0_i32_0 : i32, i32, i32
  }
  func.func @transform_1(%arg0: i32) -> (i32, i32) {
    %c0_i32 = arith.constant 0 : i32
    %c0_i32_0 = arith.constant 0 : i32
    %c0_i32_1 = arith.constant 0 : i32
    return %c0_i32, %c0_i32_0 : i32, i32
  }
  func.func @transform_2(%arg0: i32) -> (i32, i32) {
    %c0_i32 = arith.constant 0 : i32
    %c0_i32_0 = arith.constant 0 : i32
    %c0_i32_1 = arith.constant 0 : i32
    return %c0_i32, %c0_i32_0 : i32, i32
  }
  func.func @transform_3(%arg0: i32) -> (i32, i32) {
    %c0_i32 = arith.constant 0 : i32
    %c0_i32_0 = arith.constant 0 : i32
    %c0_i32_1 = arith.constant 0 : i32
    return %c0_i32, %c0_i32_0 : i32, i32
  }
  func.func @transform_4(%arg0: i32) -> (i32, i32) {
    %c0_i32 = arith.constant 0 : i32
    %c0_i32_0 = arith.constant 0 : i32
    %c0_i32_1 = arith.constant 0 : i32
    return %c0_i32, %c0_i32_0 : i32, i32
  }
  func.func @transform_5(%arg0: i32) -> (i32, i32, i32) {
    %c0_i32 = arith.constant 0 : i32
    %c0_i32_0 = arith.constant 0 : i32
    %c0_i32_1 = arith.constant 0 : i32
    return %arg0, %c0_i32, %c0_i32_0 : i32, i32, i32
  }
}

</mosaic_0001>

<bundles_post_ra>
// kernel: tpu_custom_call.1
= control target key start
LH: loop header
LB: loop body
LE: loop exit
PB: predicated region body
PF: predicated region fallthrough
CT: control target
= control target key end

     0   :  { %10 = vsyncpa [#allocation3], 0  ;;  %s478_s0 = inlined_call_operand.hbm [shape: f32[2,4,256], index: 0, kind: input, shape index: {}]   ;;  %s479_s1 = inlined_call_operand.vmem [shape: f32[4,2], index: 1, kind: input, shape index: {}]   ;;  %s480_s2 = inlined_call_operand.vmem [shape: f32[1,2], index: 2, kind: input, shape index: {}]   ;;  %s481_s3 = inlined_call_operand.vmem [shape: f32[2,4], index: 3, kind: input, shape index: {}]   ;;  %s482_s4 = inlined_call_operand.vmem [shape: f32[1,4], index: 4, kind: input, shape index: {}]   ;;  %s483_s5 = inlined_call_operand.hbm [shape: f32[2,4,256], index: 5, kind: output, shape index: {}]  }
   0x1   :  { %11 = vsyncpa [#allocation4], 0  ;;  %s382_s18 = smov [#allocation2]   ;;  %s334_s22 = scalar_lea.hbm %s478_s0, 256 }
   0x2   :  { %s17_s19 = sshll.u32 %s382_s18, 4  ;;  %p335_p0 = scmp.ne.s32.totalorder %s478_s0, %s334_s22  ;;  %s18_s19 = int_to_ptr.vmem [resolvable:$true] %s17_s19 }
   0x3   :  { %p338_p1 = scmp.lt.u32.totalorder %s334_s22, %s478_s0 }
   0x5   :  { %p340_p2 = pnand %p338_p1, %p335_p0 }
   0x7   :  { %343 = shalt.err (!%p340_p2)
}
   0x8   :  { %s344_s27 = scalar_lea.vmem %s18_s19, 256  ;;  %p349_p4 = scmp.lt.s32.totalorder %s18_s19, %s18_s19 }
   0x9   :  { %p345_p3 = scmp.ne.s32.totalorder %s18_s19, %s344_s27  ;;  %p350_p5 = scmp.lt.s32.totalorder %s344_s27, %s344_s27 }
   0xb   :  { %p351_p6 = por %p350_p5, %p349_p4 }
   0xd   :  { %p352_p7 = pnand %p351_p6, %p345_p3 }
   0xf   :  { %355 = shalt.err (!%p352_p7)
}
  0x10   :  { %s383_s28 = smov 128   ;;  %s384_s29 = smov 8  }
  0x11   :  { %23 = dma.hbm_to_vmem [thread:$0]  %s478_s0, 256, %s18_s19, [#allocation3], %s383_s28, %s383_s28, %s384_s29  }
  0x12   :  { %378 = dma.done.wait [#allocation3], 256  }
  0x13   :  { %379 = vsyncadd [#allocation3], 4294967040  ;;  %vm43_vm0 = vcmask 1043456   ;;  %v434_v0 = vld [vmem:[#allocation2] sm:$0xff]  ;;  %v436_v1 = vld [vmem:[#allocation2 + $0x8] sm:$0xff]  ;;  %v385_v11 = vmov 0.0   ;;  %v66_v12 = vlaneseq }
  0x14   :  { %v39_v2 = vcombine.high %v434_v0, %v434_v0  ;;  %v44_v3 = vsel %vm43_vm0, %v434_v0, 0.0  ;;  %v40_v4 = vcombine.high %v436_v1, %v436_v1  ;;  %v49_v6 = vsel %vm43_vm0, %v436_v1, 0.0  ;;  %v56_v10 = vld [vmem:[%s479_s1] sm:$0xf]  ;;  %311 = vmatprep.subr.mxu0 %v385_v11  ;;  %316 = vmatprep.subr.mxu1 %v385_v11 }
  0x15   :  { %vm386_vm1 = vmmov 0   ;;  %312 = vmatpush3.msk.msra.mxu0 %vm43_vm0, %v56_v10  ;;  %v67_v13 = vand.u32 127, %v66_v12  ;;  %v69_v14 = vshrl.u32 %v66_v12, 7  ;;  %vm76_vm2 = vcmask 1041409   ;;  %v155_v23 = vld [vmem:[%s481_s3] sm:$0x3] }
  0x16   :  { %v45_v5 = vsel %vm43_vm0, %v39_v2, 0.0  ;;  %v50_v7 = vsel %vm43_vm0, %v40_v4, 0.0  ;;  %313 = vmatprep.mubr.msk.f32.mxu0 %vm386_vm1, %v385_v11  ;;  %318 = vmatprep.mubr.msk.f32.mxu1 %vm386_vm1, %v385_v11  ;;  %vm78_vm3 = vcmask 31744   ;;  %vm167_vm4 = vcmask 1041408   ;;  %v300_v24 = vld [vmem:[%s480_s2] ss:$0 sm:$0xff] }
  0x17   :  { %v46_v8 = vadd.f32 %v45_v5, %v44_v3  ;;  %v51_v9 = vadd.f32 %v50_v7, %v49_v6  ;;  %v70_v16 = vsub.s32 %v67_v13, %v69_v14  ;;  %317 = vmatpush3.msk.msra.mxu1 %vm167_vm4, %v155_v23  ;;  %vm163_vm5 = vcmask 15360   ;;  %v303_v29 = vld [vmem:[%s482_s4] ss:$0 sm:$0xff]  ;;  %s388_s2 = smov [#allocation5]  }
  0x18   :  { %v249_v36 = vsub.s32 0, %v69_v14  ;;  %v256_v39 = vsub.s32 1, %v69_v14  ;;  %v387_v41 = vmov 839922192   ;;  %s288_s3 = sshll.u32 %s388_s2, 4  ;;  %s289_s3 = int_to_ptr.vmem [resolvable:$true] %s288_s3 }
  0x19   :  { %47 = vadd.xlane.f32.xlu0 %v46_v8  ;;  %v264_v42 = vunpack.c.l.s4 %v387_v41  ;;  %s356_s4 = scalar_lea.vmem %s289_s3, 256  ;;  %p361_p9 = scmp.lt.s32.totalorder %s289_s3, %s289_s3 }
  0x1a   :  { %p357_p8 = scmp.ne.s32.totalorder %s289_s3, %s356_s4  ;;  %p362_p10 = scmp.lt.s32.totalorder %s356_s4, %s356_s4 }
  0x1b   :  { %v265_v43 = vunpack.c.0.s8 %v264_v42 }
  0x1c   :  { %p363_p11 = por %p362_p10, %p361_p9 }
  0x1d   :  { %52 = vadd.xlane.f32.xlu0 %v51_v9  ;;  %v268_v44 = vsub.s32 %v265_v43, %v69_v14 }
  0x1e   :  { %p364_p12 = pnand %p363_p11, %p357_p8 }
  0xa6   :  { %v48_v15 = vpop.xlane.xlu0 %47 }
  0xa7   :  { %v54_v17 = vmul.f32 0.00390625, %v48_v15 }
  0xa9   :  { %v71_v20 = vrot.slane %v54_v17, %v70_v16 }
  0xaa   :  { %v53_v18 = vpop.xlane.xlu0 %52 }
  0xab   :  { %v55_v19 = vmul.f32 0.00390625, %v53_v18 }
  0xad   :  { %v75_v21 = vrot.slane %v55_v19, %v70_v16 }
  0xaf   :  { %v77_v22 = vsel %vm76_vm2, %v75_v21, %v71_v20 }
  0xb0   :  { %314 = vmatmul.mubr.msk.f32.vlgmr.msra.gmra.mrb[0].mxu0 %vm78_vm3, %v77_v22 }
 0x183   :  { %v150_v25 = vpop.f32.mrb[0].mxu0 }
 0x184   :  { %v151_v26 = vadd.f32 %v300_v24, %v150_v25  ;;  %v315_v27 = vpop.f32.mrb[1].mxu0 }
 0x186   :  { %v154_v28 = vmax.f32 %v151_v26, 0.0 }
 0x188   :  { %319 = vmatmul.mubr.msk.f32.vlgmr.msra.gmra.mrb[0].mxu1 %vm163_vm5, %v154_v28 }
 0x25b   :  { %v237_v30 = vpop.f32.mrb[0].mxu1 }
 0x25c   :  { %v238_v31 = vadd.f32 %v303_v29, %v237_v30  ;;  %v320_v32 = vpop.f32.mrb[1].mxu1 }
 0x25e   :  { %v306_v33 = vmul.f32 -1.442695, %v238_v31 }
 0x260   :  { %330 = vpow2.f32 %v306_v33 }
 0x26a   :  { %v331_v34 = vpop.eup %330 }
 0x26b   :  { %v244_v35 = vadd.f32 1.0, %v331_v34 }
 0x26d   :  { %332 = vrcp.f32 %v244_v35 }
 0x277   :  { %v333_v37 = vpop.eup %332 }
 0x278   :  { %v250_v38 = vrot.slane %v333_v37, %v249_v36  ;;  %v257_v40 = vrot.slane %v333_v37, %v256_v39 }
 0x27a   :  { %252 = vbcast.lane.b32.xlu1 %v250_v38, 256 }
 0x27e   :  { %259 = vbcast.lane.b32.xlu1 %v257_v40, 256 }
 0x2ec   :  { %v253_v45 = vpop.permute.xlu1 %252 }
 0x2ed   :  { %v269_v46 = vrot.slane %v253_v45, %v268_v44 }
 0x2ef   :  { %v279_v47 = vmul.f32 %v269_v46, %v434_v0 }
 0x2f0   :  { %v260_v48 = vpop.permute.xlu1 %259 }
 0x2f1   :  { %281 = vst [vmem:[#allocation5] sm:$0xff] %v279_v47  ;;  %v276_v49 = vrot.slane %v260_v48, %v268_v44 }
 0x2f3   :  { %v280_v50 = vmul.f32 %v276_v49, %v436_v1 }
 0x2f5   :  { %282 = vst [vmem:[#allocation5 + $0x8] sm:$0xff] %v280_v50 }
 0x2f6   :  { %367 = shalt.err (!%p364_p12)
}
 0x2f7   :  { %s368_s15 = scalar_lea.hbm %s483_s5, 256 }
 0x2f8   :  { %p369_p13 = scmp.ne.s32.totalorder %s483_s5, %s368_s15  ;;  %p372_p0 = scmp.lt.u32.totalorder %s368_s15, %s483_s5 }
 0x2fa   :  { %p374_p1 = pnand %p372_p0, %p369_p13 }
 0x2fc   :  { %377 = shalt.err (!%p374_p1)
}
 0x2fd   :  { %294 = dma.vmem_to_hbm [thread:$0]  %s289_s3, 256, %s483_s5, [#allocation4], %s383_s28, %s383_s28, %s384_s29  }
 0x2fe   :  { %380 = dma.done.wait [#allocation4], 256  }
 0x2ff   :  { %381 = vsyncadd [#allocation4], 4294967040 }
 0x300   :  { %298 = vsyncpa [#allocation3], 1 }
 0x301   :  { %299 = vsyncpa [#allocation4], 1 }

</bundles_post_ra>
